<compile_context>
chip_gen: v6e
topology: v6e:2x2x1
jax: 0.10.0
libtpu: 0.0.40
codegen_flags: <defaults>
</compile_context>

<pallas_src>
import functools

import jax
import jax.numpy as jnp
from jax.experimental import pallas as pl
from jax.experimental.pallas import tpu as pltpu

LN_EPS = 1e-5   # PyTorch nn.LayerNorm default eps
OUT_PAD = 128   # lane-dense output width (action_dim columns are the prefix)


# ----------------------------- in-kernel helpers ----------------------------


def _layer_norm(x, g, b):
    mu = jnp.mean(x, axis=-1, keepdims=True)
    var = jnp.mean((x - mu) ** 2, axis=-1, keepdims=True)
    return (x - mu) * jax.lax.rsqrt(var + LN_EPS) * g + b


def _actor_head(x, wstack, a_biases, outw, hidden_dim):
    """3x(Linear->ReLU) -> (padded) Linear -> Tanh, lane-dense (rows, 128) out."""
    h = x
    for i in range(3):
        h = jnp.maximum(
            jnp.dot(h, wstack[i], preferred_element_type=jnp.float32) + a_biases[i], 0.0)
    w4 = outw[:hidden_dim]          # (H, 128), zero beyond action_dim
    b4 = outw[hidden_dim:hidden_dim + 1]  # (1, 128)
    return jnp.tanh(jnp.dot(h, w4, preferred_element_type=jnp.float32) + b4)


# ----------------------------- fused kernels --------------------------------


def _dense_fused_kernel(x_ref, few_ref, vecs_ref, wstack_ref, outw_ref, o_ref,
                        *, hidden_dim):
    vecs = vecs_ref[...]                       # (6, H)
    fe_b, fe_g, fe_beta = vecs[0:1], vecs[1:2], vecs[2:3]
    a_biases = (vecs[3:4], vecs[4:5], vecs[5:6])

    # feature_extractor: Linear -> ReLU -> LayerNorm
    h = jnp.dot(x_ref[...], few_ref[...], preferred_element_type=jnp.float32) + fe_b
    xf = _layer_norm(jnp.maximum(h, 0.0), fe_g, fe_beta)

    o_ref[...] = _actor_head(xf, wstack_ref[...], a_biases, outw_ref[...], hidden_dim)


def _attn_fused_kernel(x_ref, few_ref, qkvo_ref, vecs_ref, wstack_ref, outw_ref, o_ref,
                       *, num_batches, seq_len, num_heads, hidden_dim):
    TB, S, NH, H = num_batches, seq_len, num_heads, hidden_dim
    hd = H // NH
    K = NH * S

    vecs = vecs_ref[...]                       # (12, H)
    fe_b, fe_g, fe_beta = vecs[0:1], vecs[1:2], vecs[2:3]
    bq, bk, bv, bo = vecs[3:4], vecs[4:5], vecs[5:6], vecs[6:7]
    ag, abeta = vecs[7:8], vecs[8:9]
    a_biases = (vecs[9:10], vecs[10:11], vecs[11:12])

    # feature_extractor on the flat (TB*S, IN) row slab
    h = jnp.dot(x_ref[...], few_ref[...], preferred_element_type=jnp.float32) + fe_b
    xf = _layer_norm(jnp.maximum(h, 0.0), fe_g, fe_beta)        # (TB*S, H)

    # Q/K/V/O projections (1/scale is already folded into wq/bq).
    qkvo = qkvo_ref[...]                                        # (4, H, H)
    q = jnp.dot(xf, qkvo[0], preferred_element_type=jnp.float32) + bq
    k = jnp.dot(xf, qkvo[1], preferred_element_type=jnp.float32) + bk
    v = jnp.dot(xf, qkvo[2], preferred_element_type=jnp.float32) + bv
    q3 = q.reshape(TB, S, H)
    k3 = k.reshape(TB, S, H)
    v3 = v.reshape(TB, S, H)

    # Head structure built in-kernel from iota (no extra operands):
    #   hmask[r, d] = 1 iff expanded-key row r (= h*S + j) keeps head h's columns
    #   bones[r, c] = 1 iff rows r, c belong to the same head block
    row_head = jax.lax.broadcasted_iota(jnp.int32, (K, H), 0) // S
    col_head = jax.lax.broadcasted_iota(jnp.int32, (K, H), 1) // hd
    hmask = (row_head == col_head).astype(jnp.float32)          # (K, H)
    r_k = jax.lax.broadcasted_iota(jnp.int32, (K, K), 0) // S
    c_k = jax.lax.broadcasted_iota(jnp.int32, (K, K), 1) // S
    bones = (r_k == c_k).astype(jnp.float32)                    # (K, K)

    # Head-expanded K/V via broadcast (one tiled copy, no list concat).
    k_exp = (jnp.broadcast_to(k3[:, None, :, :], (TB, NH, S, H)).reshape(TB, K, H)
             * hmask[None, :, :])
    v_exp = (jnp.broadcast_to(v3[:, None, :, :], (TB, NH, S, H)).reshape(TB, K, H)
             * hmask[None, :, :])

    # Per-head scores from one full-H batched contraction.
    scores = jnp.einsum('bqd,bkd->bqk', q3, k_exp,
                        preferred_element_type=jnp.float32)     # (TB, S, K)
    # Per-head softmax: row-global max shift is exact per head block; the
    # per-block denominator is one matmul with block-diagonal ones, and the
    # normalization uses the EUP reciprocal instead of a vector divide.
    e = jnp.exp(scores - jnp.max(scores, axis=-1, keepdims=True))
    e2 = e.reshape(TB * S, K)
    denom = jnp.dot(e2, bones, preferred_element_type=jnp.float32)
    p3 = (e2 * pl.reciprocal(denom, approx=False)).reshape(TB, S, K)
    # TODO(synk): attention-weight dropout treated as identity (eval mode).
    attn = jnp.einsum('bqk,bkd->bqd', p3, v_exp,
                      preferred_element_type=jnp.float32).reshape(TB * S, H)

    out = jnp.dot(attn, qkvo[3], preferred_element_type=jnp.float32) + bo
    y = _layer_norm(xf + out, ag, abeta) + xf    # MHA LayerNorm + outer residual

    o_ref[...] = _actor_head(y, wstack_ref[...], a_biases, outw_ref[...], hidden_dim)


# ----------------------------- tiling helpers --------------------------------


def _pad_rows_and_tile(n, in_dim, hid, budget_bytes=8 << 20):
    """Pad row count to a multiple of 8 and pick one big VMEM-budgeted tile."""
    bytes_per_row = 4 * (2 * in_dim + 2 * OUT_PAD + 12 * hid)   # dbl-buffered io + temps
    cap = max(8, (budget_bytes // bytes_per_row) // 8 * 8)
    n8 = ((n + 7) // 8) * 8
    steps = -(-n8 // cap)
    tile = ((-(-n8 // steps) + 7) // 8) * 8
    return tile * steps, tile


def _attn_batch_tile(B, S, in_dim, hid, num_heads, budget_bytes=8 << 20):
    """Largest batch tile under the VMEM budget (prefers one grid step)."""
    K = num_heads * S
    per_b = 4 * (S * (2 * in_dim + 2 * OUT_PAD + 12 * hid) + 3 * K * hid + 2 * S * K)
    cap = max(1, budget_bytes // per_b)
    if B <= cap:
        return B
    cands = [tb for tb in range(1, min(B, cap) + 1)
             if B % tb == 0 and (tb * S) % 8 == 0]
    return max(cands) if cands else B


def _const_spec(w):
    return pl.BlockSpec(w.shape, lambda i, nd=w.ndim: (0,) * nd)


def _vmem_limit(stream_bytes, weight_bytes, interm_bytes):
    return int(min(32 << 20, max(4 << 20, 2 * (stream_bytes + weight_bytes + interm_bytes))))


# ----------------------------- wrappers --------------------------------------


def _pack_actor(p):
    hid = p['a1_w'].shape[0]
    adim = p['a4_w'].shape[1]
    wstack = jnp.stack([p['a1_w'], p['a2_w'], p['a3_w']], axis=0)       # (3, H, H)
    outw = jnp.zeros((hid + 1, OUT_PAD), jnp.float32)
    outw = outw.at[:hid, :adim].set(p['a4_w']).at[hid, :adim].set(p['a4_b'])
    return wstack, outw


def _run_dense(x2d, p):
    n, in_dim = x2d.shape
    hid = p['fe_w'].shape[1]
    adim = p['a4_w'].shape[1]

    n_pad, tile = _pad_rows_and_tile(n, in_dim, hid)
    if n_pad != n:
        x2d = jnp.pad(x2d, ((0, n_pad - n), (0, 0)))

    vecs = jnp.stack([p['fe_b'], p['fe_g'], p['fe_beta'],
                      p['a1_b'], p['a2_b'], p['a3_b']], axis=0)          # (6, H)
    wstack, outw = _pack_actor(p)
    weights = (p['fe_w'], vecs, wstack, outw)

    wbytes = 4 * sum(int(w.size) for w in weights)
    limit = _vmem_limit(2 * tile * (in_dim + OUT_PAD) * 4, 2 * wbytes, tile * hid * 48)
    flops = 2 * n_pad * (in_dim * hid + 3 * hid * hid + hid * OUT_PAD)
    ce = pl.CostEstimate(flops=int(flops), transcendentals=int(n_pad * OUT_PAD),
                         bytes_accessed=int(4 * n_pad * (in_dim + OUT_PAD) + wbytes))

    out = pl.pallas_call(
        functools.partial(_dense_fused_kernel, hidden_dim=hid),
        out_shape=jax.ShapeDtypeStruct((n_pad, OUT_PAD), jnp.float32),
        grid=(n_pad // tile,),
        in_specs=[pl.BlockSpec((tile, in_dim), lambda i: (i, 0))]
                 + [_const_spec(w) for w in weights],
        out_specs=pl.BlockSpec((tile, OUT_PAD), lambda i: (i, 0)),
        compiler_params=pltpu.CompilerParams(
            dimension_semantics=("arbitrary",), vmem_limit_bytes=limit),
        cost_estimate=ce,
    )(x2d, *weights)
    return out[:n, :adim]


def _run_attention(x3d, p, num_heads):
    B, S, in_dim = x3d.shape
    hid = p['fe_w'].shape[1]
    adim = p['a4_w'].shape[1]
    assert hid % num_heads == 0, 'hidden_dim must be divisible by num_heads'
    hd = hid // num_heads
    inv_scale = 1.0 / (float(hd) ** 0.5)

    tb = _attn_batch_tile(B, S, in_dim, hid, num_heads)
    rows = tb * S
    K = num_heads * S

    vecs = jnp.stack([p['fe_b'], p['fe_g'], p['fe_beta'],
                      p['bq'] * inv_scale, p['bk'], p['bv'], p['bo'],
                      p['attn_g'], p['attn_beta'],
                      p['a1_b'], p['a2_b'], p['a3_b']], axis=0)          # (12, H)
    qkvo = jnp.stack([p['wq'] * inv_scale, p['wk'], p['wv'], p['wo']], axis=0)
    wstack, outw = _pack_actor(p)
    weights = (p['fe_w'], qkvo, vecs, wstack, outw)

    wbytes = 4 * sum(int(w.size) for w in weights)
    interm = 4 * (rows * hid * 16 + 3 * tb * K * hid + 3 * rows * K)
    limit = _vmem_limit(2 * rows * (in_dim + OUT_PAD) * 4, 2 * wbytes, interm)
    flops = 2 * B * S * (in_dim * hid + 7 * hid * hid + hid * OUT_PAD) \
        + 4 * B * S * K * hid
    ce = pl.CostEstimate(flops=int(flops), transcendentals=int(B * S * (K + OUT_PAD)),
                         bytes_accessed=int(4 * B * S * (in_dim + OUT_PAD) + wbytes))

    x2d = x3d.reshape(B * S, in_dim)
    kern = functools.partial(_attn_fused_kernel, num_batches=tb, seq_len=S,
                             num_heads=num_heads, hidden_dim=hid)
    out2d = pl.pallas_call(
        kern,
        out_shape=jax.ShapeDtypeStruct((B * S, OUT_PAD), jnp.float32),
        grid=(B // tb,),
        in_specs=[pl.BlockSpec((rows, in_dim), lambda i: (i, 0))]
                 + [_const_spec(w) for w in weights],
        out_specs=pl.BlockSpec((rows, OUT_PAD), lambda i: (i, 0)),
        compiler_params=pltpu.CompilerParams(
            dimension_semantics=("arbitrary",), vmem_limit_bytes=limit),
        cost_estimate=ce,
    )(x2d, *weights)
    return out2d[:, :adim].reshape(B, S, adim)


def joint_actor_forward(params, state, use_attention=False, num_heads=4):
    """Pallas implementation of JointActor.forward. state: (..., input_dim)."""
    lead = state.shape[:-1]
    in_dim = state.shape[-1]
    adim = params['a4_w'].shape[1]
    if use_attention:
        x3 = state[:, None, :] if state.ndim == 2 else state
        mean = _run_attention(x3, params, num_heads).reshape(*lead, adim)
    else:
        mean = _run_dense(state.reshape(-1, in_dim), params).reshape(*lead, adim)
    # action_std is data-independent -> computed once outside the kernel.
    std = jnp.broadcast_to(jnp.maximum(jnp.exp(params['log_std']), 1e-3), mean.shape)
    return mean, std


# ------------------------- parameters & reference ----------------------------


def init_params(key, input_dim, hidden_dim, action_dim):
    def xavier(k, fi, fo):
        lim = (6.0 / (fi + fo)) ** 0.5
        return jax.random.uniform(k, (fi, fo), jnp.float32, -lim, lim)

    ks = jax.random.split(key, 16)
    z = lambda n: jnp.zeros((n,), jnp.float32)
    o = lambda n: jnp.ones((n,), jnp.float32)
    return {
        'fe_w': xavier(ks[0], input_dim, hidden_dim), 'fe_b': z(hidden_dim),
        'fe_g': o(hidden_dim), 'fe_beta': z(hidden_dim),
        'wq': xavier(ks[1], hidden_dim, hidden_dim), 'bq': z(hidden_dim),
        'wk': xavier(ks[2], hidden_dim, hidden_dim), 'bk': z(hidden_dim),
        'wv': xavier(ks[3], hidden_dim, hidden_dim), 'bv': z(hidden_dim),
        'wo': xavier(ks[4], hidden_dim, hidden_dim), 'bo': z(hidden_dim),
        'attn_g': o(hidden_dim), 'attn_beta': z(hidden_dim),
        'a1_w': xavier(ks[5], hidden_dim, hidden_dim), 'a1_b': z(hidden_dim),
        'a2_w': xavier(ks[6], hidden_dim, hidden_dim), 'a2_b': z(hidden_dim),
        'a3_w': xavier(ks[7], hidden_dim, hidden_dim), 'a3_b': z(hidden_dim),
        'a4_w': xavier(ks[8], hidden_dim, action_dim), 'a4_b': z(action_dim),
        'log_std': z(action_dim),
    }


def reference_forward(p, state, use_attention, num_heads):
    """Pure-JAX mirror of the PyTorch forward (eval mode) for verification."""
    def ln(x, g, b):
        mu = x.mean(-1, keepdims=True)
        var = ((x - mu) ** 2).mean(-1, keepdims=True)
        return (x - mu) / jnp.sqrt(var + LN_EPS) * g + b

    x = ln(jax.nn.relu(state @ p['fe_w'] + p['fe_b']), p['fe_g'], p['fe_beta'])
    if use_attention:
        xq = x[:, None, :] if x.ndim == 2 else x
        B, S, H = xq.shape
        hd = H // num_heads
        sc = hd ** 0.5
        q = (xq @ p['wq'] + p['bq']).reshape(B, S, num_heads, hd).transpose(0, 2, 1, 3)
        k = (xq @ p['wk'] + p['bk']).reshape(B, S, num_heads, hd).transpose(0, 2, 1, 3)
        v = (xq @ p['wv'] + p['bv']).reshape(B, S, num_heads, hd).transpose(0, 2, 1, 3)
        scores = jnp.einsum('bhqd,bhkd->bhqk', q, k) / sc
        attn = jax.nn.softmax(scores, axis=-1)
        ao = jnp.einsum('bhqk,bhkd->bhqd', attn, v).transpose(0, 2, 1, 3).reshape(B, S, H)
        ao = ao @ p['wo'] + p['bo']
        xa = ln(xq + ao, p['attn_g'], p['attn_beta'])
        x = (xa + xq).reshape(x.shape)
    h = jax.nn.relu(x @ p['a1_w'] + p['a1_b'])
    h = jax.nn.relu(h @ p['a2_w'] + p['a2_b'])
    h = jax.nn.relu(h @ p['a3_w'] + p['a3_b'])
    mean = jnp.tanh(h @ p['a4_w'] + p['a4_b'])
    std = jnp.broadcast_to(jnp.maximum(jnp.exp(p['log_std']), 1e-3), mean.shape)
    return mean, std


# --------------------------------- main --------------------------------------

if __name__ == "__main__":
    input_dim, hidden_dim, action_dim, num_heads = 16, 32, 8, 4
    key = jax.random.PRNGKey(0)
    kp, k1, k2 = jax.random.split(key, 3)
    params = init_params(kp, input_dim, hidden_dim, action_dim)

    # Config 1: default JointActor (use_attention=False), 2-D state (batch, input_dim)
    state2d = jax.random.normal(k1, (8, input_dim), jnp.float32)
    m1, s1 = joint_actor_forward(params, state2d, use_attention=False, num_heads=num_heads)
    rm1, rs1 = reference_forward(params, state2d, False, num_heads)

    # Config 2: use_attention=True, 3-D state (batch, seq, input_dim)
    state3d = jax.random.normal(k2, (2, 8, input_dim), jnp.float32)
    m2, s2 = joint_actor_forward(params, state3d, use_attention=True, num_heads=num_heads)
    rm2, rs2 = reference_forward(params, state3d, True, num_heads)

    jax.block_until_ready((m1, s1, m2, s2))

    assert m1.shape == (8, action_dim) and s1.shape == (8, action_dim)
    assert m2.shape == (2, 8, action_dim) and s2.shape == (2, 8, action_dim)
    assert jnp.allclose(m1, rm1, atol=1e-4, rtol=1e-4)
    assert jnp.allclose(s1, rs1, atol=1e-6)
    assert jnp.allclose(m2, rm2, atol=1e-4, rtol=1e-4)
    assert jnp.allclose(s2, rs2, atol=1e-6)

    print("KERNEL_OK")
</pallas_src>

<mosaic_0001>
module attributes {stable_mosaic.version = 11 : i64} {
  func.func @_dense_fused_kernel(%arg0: i32, %arg1: memref<8x16xf32, #tpu.memory_space<vmem>>, %arg2: memref<16x32xf32, #tpu.memory_space<vmem>>, %arg3: memref<6x32xf32, #tpu.memory_space<vmem>>, %arg4: memref<3x32x32xf32, #tpu.memory_space<vmem>>, %arg5: memref<33x128xf32, #tpu.memory_space<vmem>>, %arg6: memref<8x128xf32, #tpu.memory_space<vmem>>) attributes {dimension_semantics = [#tpu.dimension_semantics<arbitrary>], iteration_bounds = array<i64: 1>, scalar_prefetch = 0 : i64, scratch_operands = 0 : i64, tpu.core_type = #tpu.core_type<tc>, window_params = [{transform_indices = @transform_0, window_bounds = array<i64: 8, 16>}, {pipeline_mode = #tpu.pipeline_mode<synchronous>, transform_indices = @transform_1, window_bounds = array<i64: 16, 32>}, {pipeline_mode = #tpu.pipeline_mode<synchronous>, transform_indices = @transform_2, window_bounds = array<i64: 6, 32>}, {pipeline_mode = #tpu.pipeline_mode<synchronous>, transform_indices = @transform_3, window_bounds = array<i64: 3, 32, 32>}, {pipeline_mode = #tpu.pipeline_mode<synchronous>, transform_indices = @transform_4, window_bounds = array<i64: 33, 128>}, {transform_indices = @transform_5, window_bounds = array<i64: 8, 128>}]} {
    %c0 = arith.constant 0 : index
    %c0_0 = arith.constant 0 : index
    %0 = vector.load %arg3[%c0, %c0_0] : memref<6x32xf32, #tpu.memory_space<vmem>>, vector<6x32xf32>
    %1 = vector.extract_strided_slice %0 {offsets = [0, 0], sizes = [1, 32], strides = [1, 1]} : vector<6x32xf32> to vector<1x32xf32>
    %2 = vector.extract_strided_slice %0 {offsets = [1, 0], sizes = [1, 32], strides = [1, 1]} : vector<6x32xf32> to vector<1x32xf32>
    %3 = vector.extract_strided_slice %0 {offsets = [2, 0], sizes = [1, 32], strides = [1, 1]} : vector<6x32xf32> to vector<1x32xf32>
    %4 = vector.extract_strided_slice %0 {offsets = [3, 0], sizes = [1, 32], strides = [1, 1]} : vector<6x32xf32> to vector<1x32xf32>
    %5 = vector.extract_strided_slice %0 {offsets = [4, 0], sizes = [1, 32], strides = [1, 1]} : vector<6x32xf32> to vector<1x32xf32>
    %6 = vector.extract_strided_slice %0 {offsets = [5, 0], sizes = [1, 32], strides = [1, 1]} : vector<6x32xf32> to vector<1x32xf32>
    %c0_1 = arith.constant 0 : index
    %c0_2 = arith.constant 0 : index
    %7 = vector.load %arg1[%c0_1, %c0_2] : memref<8x16xf32, #tpu.memory_space<vmem>>, vector<8x16xf32>
    %c0_3 = arith.constant 0 : index
    %c0_4 = arith.constant 0 : index
    %8 = vector.load %arg2[%c0_3, %c0_4] : memref<16x32xf32, #tpu.memory_space<vmem>>, vector<16x32xf32>
    %cst = arith.constant dense<0.000000e+00> : vector<8x32xf32>
    %9 = tpu.matmul %7, %8, %cst {dimension_numbers = #tpu.dot_dimension_numbers<[1], [0], [0], [1], [0, 0, 1, 1], [], []>} : vector<8x16xf32>, vector<16x32xf32>, vector<8x32xf32> -> vector<8x32xf32>
    %10 = vector.broadcast %1 : vector<1x32xf32> to vector<8x32xf32>
    %11 = arith.addf %9, %10 : vector<8x32xf32>
    %cst_5 = arith.constant 0.000000e+00 : f32
    %12 = vector.broadcast %cst_5 : f32 to vector<8x32xf32>
    %13 = arith.maximumf %11, %12 : vector<8x32xf32>
    %cst_6 = arith.constant dense<0.000000e+00> : vector<8xf32>
    %14 = vector.multi_reduction <add>, %13, %cst_6 [1] : vector<8x32xf32> to vector<8xf32>
    %15 = vector.shape_cast %14 : vector<8xf32> to vector<8x1xf32>
    %cst_7 = arith.constant 3.200000e+01 : f32
    %16 = vector.broadcast %cst_7 : f32 to vector<8x1xf32>
    %17 = arith.divf %15, %16 : vector<8x1xf32>
    %18 = vector.broadcast %17 : vector<8x1xf32> to vector<8x32xf32>
    %19 = arith.subf %13, %18 : vector<8x32xf32>
    %20 = arith.mulf %19, %19 : vector<8x32xf32>
    %cst_8 = arith.constant dense<0.000000e+00> : vector<8xf32>
    %21 = vector.multi_reduction <add>, %20, %cst_8 [1] : vector<8x32xf32> to vector<8xf32>
    %22 = vector.shape_cast %21 : vector<8xf32> to vector<8x1xf32>
    %cst_9 = arith.constant 3.200000e+01 : f32
    %23 = vector.broadcast %cst_9 : f32 to vector<8x1xf32>
    %24 = arith.divf %22, %23 : vector<8x1xf32>
    %25 = vector.broadcast %17 : vector<8x1xf32> to vector<8x32xf32>
    %26 = arith.subf %13, %25 : vector<8x32xf32>
    %cst_10 = arith.constant 9.99999974E-6 : f32
    %27 = vector.broadcast %cst_10 : f32 to vector<8x1xf32>
    %28 = arith.addf %24, %27 : vector<8x1xf32>
    %29 = math.rsqrt %28 : vector<8x1xf32>
    %30 = vector.broadcast %29 : vector<8x1xf32> to vector<8x32xf32>
    %31 = arith.mulf %26, %30 : vector<8x32xf32>
    %32 = vector.broadcast %2 : vector<1x32xf32> to vector<8x32xf32>
    %33 = arith.mulf %31, %32 : vector<8x32xf32>
    %34 = vector.broadcast %3 : vector<1x32xf32> to vector<8x32xf32>
    %35 = arith.addf %33, %34 : vector<8x32xf32>
    %c0_11 = arith.constant 0 : index
    %c0_12 = arith.constant 0 : index
    %c0_13 = arith.constant 0 : index
    %36 = vector.load %arg4[%c0_11, %c0_12, %c0_13] : memref<3x32x32xf32, #tpu.memory_space<vmem>>, vector<3x32x32xf32>
    %c0_14 = arith.constant 0 : index
    %c0_15 = arith.constant 0 : index
    %37 = vector.load %arg5[%c0_14, %c0_15] : memref<33x128xf32, #tpu.memory_space<vmem>>, vector<33x128xf32>
    %38 = vector.extract_strided_slice %36 {offsets = [0, 0, 0], sizes = [1, 32, 32], strides = [1, 1, 1]} : vector<3x32x32xf32> to vector<1x32x32xf32>
    %39 = vector.shape_cast %38 : vector<1x32x32xf32> to vector<32x32xf32>
    %cst_16 = arith.constant dense<0.000000e+00> : vector<8x32xf32>
    %40 = tpu.matmul %35, %39, %cst_16 {dimension_numbers = #tpu.dot_dimension_numbers<[1], [0], [0], [1], [0, 0, 1, 1], [], []>} : vector<8x32xf32>, vector<32x32xf32>, vector<8x32xf32> -> vector<8x32xf32>
    %41 = vector.broadcast %4 : vector<1x32xf32> to vector<8x32xf32>
    %42 = arith.addf %40, %41 : vector<8x32xf32>
    %cst_17 = arith.constant 0.000000e+00 : f32
    %43 = vector.broadcast %cst_17 : f32 to vector<8x32xf32>
    %44 = arith.maximumf %42, %43 : vector<8x32xf32>
    %45 = vector.extract_strided_slice %36 {offsets = [1, 0, 0], sizes = [1, 32, 32], strides = [1, 1, 1]} : vector<3x32x32xf32> to vector<1x32x32xf32>
    %46 = vector.shape_cast %45 : vector<1x32x32xf32> to vector<32x32xf32>
    %cst_18 = arith.constant dense<0.000000e+00> : vector<8x32xf32>
    %47 = tpu.matmul %44, %46, %cst_18 {dimension_numbers = #tpu.dot_dimension_numbers<[1], [0], [0], [1], [0, 0, 1, 1], [], []>} : vector<8x32xf32>, vector<32x32xf32>, vector<8x32xf32> -> vector<8x32xf32>
    %48 = vector.broadcast %5 : vector<1x32xf32> to vector<8x32xf32>
    %49 = arith.addf %47, %48 : vector<8x32xf32>
    %cst_19 = arith.constant 0.000000e+00 : f32
    %50 = vector.broadcast %cst_19 : f32 to vector<8x32xf32>
    %51 = arith.maximumf %49, %50 : vector<8x32xf32>
    %52 = vector.extract_strided_slice %36 {offsets = [2, 0, 0], sizes = [1, 32, 32], strides = [1, 1, 1]} : vector<3x32x32xf32> to vector<1x32x32xf32>
    %53 = vector.shape_cast %52 : vector<1x32x32xf32> to vector<32x32xf32>
    %cst_20 = arith.constant dense<0.000000e+00> : vector<8x32xf32>
    %54 = tpu.matmul %51, %53, %cst_20 {dimension_numbers = #tpu.dot_dimension_numbers<[1], [0], [0], [1], [0, 0, 1, 1], [], []>} : vector<8x32xf32>, vector<32x32xf32>, vector<8x32xf32> -> vector<8x32xf32>
    %55 = vector.broadcast %6 : vector<1x32xf32> to vector<8x32xf32>
    %56 = arith.addf %54, %55 : vector<8x32xf32>
    %cst_21 = arith.constant 0.000000e+00 : f32
    %57 = vector.broadcast %cst_21 : f32 to vector<8x32xf32>
    %58 = arith.maximumf %56, %57 : vector<8x32xf32>
    %59 = vector.extract_strided_slice %37 {offsets = [0, 0], sizes = [32, 128], strides = [1, 1]} : vector<33x128xf32> to vector<32x128xf32>
    %60 = vector.extract_strided_slice %37 {offsets = [32, 0], sizes = [1, 128], strides = [1, 1]} : vector<33x128xf32> to vector<1x128xf32>
    %cst_22 = arith.constant dense<0.000000e+00> : vector<8x128xf32>
    %61 = tpu.matmul %58, %59, %cst_22 {dimension_numbers = #tpu.dot_dimension_numbers<[1], [0], [0], [1], [0, 0, 1, 1], [], []>} : vector<8x32xf32>, vector<32x128xf32>, vector<8x128xf32> -> vector<8x128xf32>
    %62 = vector.broadcast %60 : vector<1x128xf32> to vector<8x128xf32>
    %63 = arith.addf %61, %62 : vector<8x128xf32>
    %64 = math.tanh %63 : vector<8x128xf32>
    %c0_23 = arith.constant 0 : index
    %c0_24 = arith.constant 0 : index
    %65 = vector.load %arg6[%c0_23, %c0_24] : memref<8x128xf32, #tpu.memory_space<vmem>>, vector<8x128xf32>
    tpu.vector_store %arg6[%c0_23, %c0_24], %64 {strides = array<i32>} : memref<8x128xf32, #tpu.memory_space<vmem>>, vector<8x128xf32>,
    return
  }
  func.func @transform_0(%arg0: i32) -> (i32, i32) {
    %c0_i32 = arith.constant 0 : i32
    %c0_i32_0 = arith.constant 0 : i32
    return %arg0, %c0_i32 : i32, i32
  }
  func.func @transform_1(%arg0: i32) -> (i32, i32) {
    %c0_i32 = arith.constant 0 : i32
    %c0_i32_0 = arith.constant 0 : i32
    %c0_i32_1 = arith.constant 0 : i32
    return %c0_i32, %c0_i32_0 : i32, i32
  }
  func.func @transform_2(%arg0: i32) -> (i32, i32) {
    %c0_i32 = arith.constant 0 : i32
    %c0_i32_0 = arith.constant 0 : i32
    %c0_i32_1 = arith.constant 0 : i32
    return %c0_i32, %c0_i32_0 : i32, i32
  }
  func.func @transform_3(%arg0: i32) -> (i32, i32, i32) {
    %c0_i32 = arith.constant 0 : i32
    %c0_i32_0 = arith.constant 0 : i32
    %c0_i32_1 = arith.constant 0 : i32
    %c0_i32_2 = arith.constant 0 : i32
    return %c0_i32, %c0_i32_0, %c0_i32_1 : i32, i32, i32
  }
  func.func @transform_4(%arg0: i32) -> (i32, i32) {
    %c0_i32 = arith.constant 0 : i32
    %c0_i32_0 = arith.constant 0 : i32
    %c0_i32_1 = arith.constant 0 : i32
    return %c0_i32, %c0_i32_0 : i32, i32
  }
  func.func @transform_5(%arg0: i32) -> (i32, i32) {
    %c0_i32 = arith.constant 0 : i32
    %c0_i32_0 = arith.constant 0 : i32
    return %arg0, %c0_i32 : i32, i32
  }
}

</mosaic_0001>

<bundles_post_ra>
// kernel: tpu_custom_call.1
= control target key start
LH: loop header
LB: loop body
LE: loop exit
PB: predicated region body
PF: predicated region fallthrough
CT: control target
= control target key end

     0   :  { %10 = vsyncpa [#allocation3], 0  ;;  %s879_s0 = inlined_call_operand.hbm [shape: f32[8,16], index: 0, kind: input, shape index: {}]   ;;  %s880_s1 = inlined_call_operand.hbm [shape: f32[16,32], index: 1, kind: input, shape index: {}]   ;;  %s881_s2 = inlined_call_operand.hbm [shape: f32[6,32], index: 2, kind: input, shape index: {}]   ;;  %s882_s3 = inlined_call_operand.hbm [shape: f32[3,32,32], index: 3, kind: input, shape index: {}]   ;;  %s883_s4 = inlined_call_operand.hbm [shape: f32[33,128], index: 4, kind: input, shape index: {}]   ;;  %s884_s5 = inlined_call_operand.hbm [shape: f32[8,128], index: 5, kind: output, shape index: {}]  }
   0x1   :  { %11 = vsyncpa [#allocation6], 0 }
   0x2   :  { %12 = vsyncpa [#allocation9], 0 }
   0x3   :  { %13 = vsyncpa [#allocation4], 0  ;;  %s762_s18 = smov [#allocation5]  }
   0x4   :  { %s29_s19 = sshll.u32 %s762_s18, 4  ;;  %s30_s19 = int_to_ptr.vmem [resolvable:$true] %s29_s19 }
   0x5   :  { %s642_s20 = scalar_lea.vmem %s30_s19, 256  ;;  %p647_p1 = scmp.lt.s32.totalorder %s30_s19, %s30_s19 }
   0x6   :  { %p643_p0 = scmp.ne.s32.totalorder %s30_s19, %s642_s20  ;;  %p648_p2 = scmp.lt.s32.totalorder %s642_s20, %s642_s20 }
   0x8   :  { %p649_p3 = por %p648_p2, %p647_p1 }
   0xa   :  { %p650_p4 = pnand %p649_p3, %p643_p0 }
   0xc   :  { %653 = shalt.err (!%p650_p4)
}
   0xd   :  { %s763_s21 = smov 128   ;;  %s764_s22 = smov 8  }
   0xe   :  { %35 = dma.hbm_to_vmem [thread:$0]  %s880_s1, 256, %s30_s19, [#allocation6], %s763_s21, %s763_s21, %s764_s22  }
   0xf   :  { %s765_s25 = smov [#allocation8]   ;;  %s766_s27 = smov [#allocation2]  }
  0x10   :  { %s51_s26 = sshll.u32 %s765_s25, 4  ;;  %s20_s28 = sshll.u32 %s766_s27, 4  ;;  %s52_s26 = int_to_ptr.vmem [resolvable:$true] %s51_s26  ;;  %s21_s28 = int_to_ptr.vmem [resolvable:$true] %s20_s28 }
  0x11   :  { %s662_s29 = scalar_lea.vmem %s52_s26, 1536  ;;  %p667_p6 = scmp.lt.s32.totalorder %s52_s26, %s52_s26 }
  0x12   :  { %p663_p5 = scmp.ne.s32.totalorder %s52_s26, %s662_s29  ;;  %p668_p7 = scmp.lt.s32.totalorder %s662_s29, %s662_s29 }
  0x14   :  { %p669_p8 = por %p668_p7, %p667_p6 }
  0x16   :  { %p670_p9 = pnand %p669_p8, %p663_p5 }
  0x18   :  { %673 = shalt.err (!%p670_p9)
}
  0x19   :  { %57 = dma.hbm_to_vmem [thread:$0]  %s882_s3, 1536, %s52_s26, [#allocation9], %s763_s21, %s763_s21, %s764_s22  }
  0x1a   :  { %s682_s1 = scalar_lea.vmem %s21_s28, 128  ;;  %p687_p11 = scmp.lt.s32.totalorder %s21_s28, %s21_s28 }
  0x1b   :  { %p683_p10 = scmp.ne.s32.totalorder %s21_s28, %s682_s1  ;;  %p688_p12 = scmp.lt.s32.totalorder %s682_s1, %s682_s1 }
  0x1d   :  { %p689_p13 = por %p688_p12, %p687_p11 }
  0x1f   :  { %p690_p0 = pnand %p689_p13, %p683_p10 }
  0x21   :  { %693 = shalt.err (!%p690_p0)
}
  0x22   :  { %23 = dma.hbm_to_vmem [thread:$0]  %s879_s0, 128, %s21_s28, [#allocation3]  }
  0x23   :  { %s767_s9 = smov [#allocation7]   ;;  %s768_s11 = smov [#allocation10]  }
  0x24   :  { %s42_s10 = sshll.u32 %s767_s9, 4  ;;  %s63_s12 = sshll.u32 %s768_s11, 4  ;;  %s43_s10 = int_to_ptr.vmem [resolvable:$true] %s42_s10  ;;  %s64_s12 = int_to_ptr.vmem [resolvable:$true] %s63_s12 }
  0x25   :  { %s702_s13 = scalar_lea.vmem %s43_s10, 128  ;;  %p707_p2 = scmp.lt.s32.totalorder %s43_s10, %s43_s10 }
  0x26   :  { %p703_p1 = scmp.ne.s32.totalorder %s43_s10, %s702_s13  ;;  %p708_p3 = scmp.lt.s32.totalorder %s702_s13, %s702_s13 }
  0x28   :  { %p709_p4 = por %p708_p3, %p707_p2 }
  0x2a   :  { %p710_p5 = pnand %p709_p4, %p703_p1 }
  0x2c   :  { %713 = shalt.err (!%p710_p5)
}
  0x2d   :  { %45 = dma.hbm_to_vmem [thread:$0]  %s881_s2, 128, %s43_s10, [#allocation6]  }
  0x2e   :  { %s722_s15 = scalar_lea.vmem %s64_s12, 640  ;;  %p727_p7 = scmp.lt.s32.totalorder %s64_s12, %s64_s12 }
  0x2f   :  { %p723_p6 = scmp.ne.s32.totalorder %s64_s12, %s722_s15  ;;  %p728_p8 = scmp.lt.s32.totalorder %s722_s15, %s722_s15 }
  0x31   :  { %p729_p9 = por %p728_p8, %p727_p7 }
  0x33   :  { %p730_p10 = pnand %p729_p9, %p723_p6 }
  0x35   :  { %733 = shalt.err (!%p730_p10)
}
  0x36   :  { %69 = dma.hbm_to_vmem [thread:$0]  %s883_s4, 640, %s64_s12, [#allocation9], %s763_s21, %s763_s21, %s764_s22  }
  0x37   :  { %754 = dma.done.wait [#allocation3], 128  }
  0x38   :  { %755 = vsyncadd [#allocation3], 4294967168 }
  0x39   :  { %756 = dma.done.wait [#allocation6], 384  }
  0x3a   :  { %757 = vsyncadd [#allocation6], 4294966912 }
  0x3b   :  { %758 = dma.done.wait [#allocation9], 2176  }
  0x3c   :  { %759 = vsyncadd [#allocation9], 4294965120  ;;  %v769_v0 = vmov 0.0   ;;  %vm770_vm0 = vmmov 0   ;;  %v88_v1 = vld [vmem:[#allocation5 + $0x8] sm:$0xff]  ;;  %v87_v2 = vld [vmem:[#allocation5] sm:$0xff]  ;;  %v89_v4 = vlaneseq }
  0x3d   :  { %569 = vmatprep.subr.mxu0 %v769_v0  ;;  %573 = vmatprep.mubr.msk.f32.mxu0 %vm770_vm0, %v769_v0  ;;  %v86_v3 = vld [vmem:[#allocation2] sm:$0xff]  ;;  %vm93_vm1 = vcmask 130048   ;;  %v839_v7 = vld [vmem:[#allocation7] sm:$0x3f]  ;;  %vm168_vm2 = vcmask 261120   ;;  %v195_v20 = vld [vmem:[#allocation8 + $0x10] sm:$0xff] }
  0x3e   :  { %576 = vmatprep.subr.mxu1 %v769_v0  ;;  %584 = vmatprep.mubr.msk.f32.mxu1 %vm770_vm0, %v769_v0  ;;  %v836_v5 = vshrl.u32 %v89_v4, 7  ;;  %v196_v19 = vld [vmem:[#allocation8 + $0x18] sm:$0xff]  ;;  %v194_v21 = vld [vmem:[#allocation8 + $0x8] sm:$0xff]  ;;  %v193_v22 = vld [vmem:[#allocation8] sm:$0xff]  ;;  %s771_s2 = smov [#allocation11]  }
  0x3f   :  { %570 = vmatpush3.msra.mxu0 %v88_v1  ;;  %577 = vmatpush3.msra.mxu1 %v196_v19  ;;  %v200_v23 = vld [vmem:[#allocation8 + $0x38] sm:$0xff]  ;;  %v199_v35 = vld [vmem:[#allocation8 + $0x30] sm:$0xff]  ;;  %v198_v36 = vld [vmem:[#allocation8 + $0x28] sm:$0xff]  ;;  %s529_s4 = sshll.u32 %s771_s2, 4  ;;  %s530_s4 = int_to_ptr.vmem [resolvable:$true] %s529_s4 }
  0x40   :  { %571 = vmatprep.subr.mxu0 %v769_v0  ;;  %v91_v6 = vsub.s32 0, %v836_v5  ;;  %578 = vmatprep.subr.mxu1 %v769_v0  ;;  %v185_v27 = vsub.s32 1, %v836_v5  ;;  %v190_v28 = vsub.s32 2, %v836_v5  ;;  %v197_v37 = vld [vmem:[#allocation8 + $0x20] sm:$0xff]  ;;  %v204_v38 = vld [vmem:[#allocation8 + $0x58] sm:$0xff]  ;;  %v212_v39 = vsub.s32 3, %v836_v5  ;;  %p739_p12 = scmp.lt.s32.totalorder %s530_s4, %s530_s4 }
  0x41   :  { %572 = vmatpush3.msra.mxu0 %v87_v2  ;;  %579 = vmatpush3.msra.mxu1 %v195_v20  ;;  %v203_v45 = vld [vmem:[#allocation8 + $0x50] sm:$0xff]  ;;  %v202_v46 = vld [vmem:[#allocation8 + $0x48] sm:$0xff]  ;;  %v201_v47 = vld [vmem:[#allocation8 + $0x40] sm:$0xff]  ;;  %v290_v49 = vsub.s32 4, %v836_v5  ;;  %v368_v58 = vsub.s32 5, %v836_v5  ;;  %s734_s17 = scalar_lea.vmem %s530_s4, 128 }
  0x42   :  { %574 = vmatmul.mubr.msk.f32.vlgmr.msra.gmra.mxu0 %vm93_vm1, %v86_v3  ;;  %587 = vmatprep.subr.mxu0 %v769_v0  ;;  %v92_v8 = vrot.slane %v839_v7, %v91_v6  ;;  %v186_v29 = vrot.slane %v839_v7, %v185_v27  ;;  %v191_v32 = vrot.slane %v839_v7, %v190_v28  ;;  %v208_v48 = vld [vmem:[#allocation10 + $0x18] sm:$0xff]  ;;  %v207_v55 = vld [vmem:[#allocation10 + $0x10] sm:$0xff]  ;;  %v206_v56 = vld [vmem:[#allocation10 + $0x8] sm:$0xff]  ;;  %p735_p11 = scmp.ne.s32.totalorder %s530_s4, %s734_s17  ;;  %p740_p13 = scmp.lt.s32.totalorder %s734_s17, %s734_s17 }
  0x43   :  { %595 = vmatprep.mubr.msk.f32.mxu0 %vm770_vm0, %v769_v0  ;;  %580 = vmatprep.subr.mxu1 %v769_v0  ;;  %v213_v40 = vrot.slane %v839_v7, %v212_v39  ;;  %v291_v50 = vrot.slane %v839_v7, %v290_v49  ;;  %v205_v57 = vld [vmem:[#allocation10] sm:$0xff]  ;;  %v369_v59 = vrot.slane %v839_v7, %v368_v58 }
  0x44   :  { %581 = vmatpush3.msra.mxu1 %v194_v21  ;;  %588 = vmatpush3.msra.mxu0 %v200_v23  ;;  %v544_v1 = vld [vmem:[#allocation10 + $0x20] ss:$0 sm:$0xff]  ;;  %p741_p0 = por %p740_p13, %p739_p12 }
  0x45   :  { %582 = vmatprep.subr.mxu1 %v769_v0  ;;  %589 = vmatprep.subr.mxu0 %v769_v0 }
  0x46   :  { %583 = vmatpush3.msra.mxu1 %v193_v22  ;;  %590 = vmatpush3.msra.mxu0 %v199_v35  ;;  %p742_p1 = pnand %p741_p0, %p735_p11 }
  0x47   :  { %598 = vmatprep.subr.mxu1 %v769_v0  ;;  %591 = vmatprep.subr.mxu0 %v769_v0 }
  0x48   :  { %592 = vmatpush3.msra.mxu0 %v198_v36 }
  0x49   :  { %593 = vmatprep.subr.mxu0 %v769_v0 }
  0x4a   :  { %594 = vmatpush3.msra.mxu0 %v197_v37 }
  0x4b   :  { %609 = vmatprep.subr.mxu0 %v769_v0 }
 0x102   :  { %v163_v9 = vpop.f32.mrf.mxu0 }
 0x103   :  { %v164_v10 = vadd.f32 %v163_v9, %v92_v8 }
 0x104   :  { %v575_v11 = vpop.f32.mrf.mxu0 }
 0x105   :  { %v167_v12 = vmax.f32 %v164_v10, 0.0 }
 0x107   :  { %v169_v13 = vsel %vm168_vm2, %v167_v12, 0.0 }
 0x108   :  { %170 = vadd.xlane.f32.xlu0 %v169_v13 }
 0x191   :  { %v171_v14 = vpop.xlane.xlu0 %170 }
 0x192   :  { %v173_v15 = vmul.f32 0.03125, %v171_v14 }
 0x194   :  { %v174_v16 = vsub.f32 %v167_v12, %v173_v15 }
 0x196   :  { %v175_v17 = vmul.f32 %v174_v16, %v174_v16 }
 0x198   :  { %v176_v18 = vsel %vm168_vm2, %v175_v17, 0.0 }
 0x199   :  { %177 = vadd.xlane.f32.xlu0 %v176_v18 }
 0x222   :  { %v178_v24 = vpop.xlane.xlu0 %177 }
 0x223   :  { %v179_v25 = vmul.f32 0.03125, %v178_v24 }
 0x225   :  { %v180_v26 = vadd.f32 1e-05, %v179_v25 }
 0x227   :  { %630 = vrsqrt.f32 %v180_v26 }
 0x234   :  { %v631_v30 = vpop.eup %630 }
 0x235   :  { %v182_v31 = vmul.f32 %v631_v30, %v174_v16 }
 0x237   :  { %v187_v33 = vmul.f32 %v186_v29, %v182_v31 }
 0x239   :  { %v192_v34 = vadd.f32 %v191_v32, %v187_v33 }
 0x23b   :  { %585 = vmatmul.mubr.msk.f32.vlgmr.msra.gmra.mxu1 %vm168_vm2, %v192_v34 }
 0x23c   :  { %606 = vmatprep.mubr.msk.f32.mxu1 %vm770_vm0, %v769_v0  ;;  %599 = vmatpush3.msra.mxu1 %v204_v38 }
 0x23d   :  { %600 = vmatprep.subr.mxu1 %v769_v0 }
 0x23e   :  { %601 = vmatpush3.msra.mxu1 %v203_v45 }
 0x23f   :  { %602 = vmatprep.subr.mxu1 %v769_v0 }
 0x240   :  { %603 = vmatpush3.msra.mxu1 %v202_v46 }
 0x241   :  { %604 = vmatprep.subr.mxu1 %v769_v0 }
 0x242   :  { %605 = vmatpush3.msra.mxu1 %v201_v47 }
 0x2fb   :  { %v283_v41 = vpop.f32.mrf.mxu1 }
 0x2fc   :  { %v284_v42 = vadd.f32 %v283_v41, %v213_v40 }
 0x2fd   :  { %v586_v43 = vpop.f32.mrf.mxu1 }
 0x2fe   :  { %v287_v44 = vmax.f32 %v284_v42, 0.0 }
 0x300   :  { %596 = vmatmul.mubr.msk.f32.vlgmr.msra.gmra.mxu0 %vm168_vm2, %v287_v44 }
 0x301   :  { %617 = vmatprep.mubr.msk.f32.mxu0 %vm770_vm0, %v769_v0  ;;  %610 = vmatpush3.msra.mxu0 %v208_v48 }
 0x302   :  { %611 = vmatprep.subr.mxu0 %v769_v0 }
 0x303   :  { %612 = vmatpush3.msra.mxu0 %v207_v55 }
 0x304   :  { %613 = vmatprep.subr.mxu0 %v769_v0 }
 0x305   :  { %614 = vmatpush3.msra.mxu0 %v206_v56 }
 0x306   :  { %615 = vmatprep.subr.mxu0 %v769_v0 }
 0x307   :  { %616 = vmatpush3.msra.mxu0 %v205_v57 }
 0x3c0   :  { %v361_v51 = vpop.f32.mrf.mxu0 }
 0x3c1   :  { %v362_v52 = vadd.f32 %v361_v51, %v291_v50 }
 0x3c2   :  { %v597_v53 = vpop.f32.mrf.mxu0 }
 0x3c3   :  { %v365_v54 = vmax.f32 %v362_v52, 0.0 }
 0x3c5   :  { %607 = vmatmul.mubr.msk.f32.vlgmr.msra.gmra.mxu1 %vm168_vm2, %v365_v54 }
 0x485   :  { %v439_v60 = vpop.f32.mrf.mxu1 }
 0x486   :  { %v440_v61 = vadd.f32 %v439_v60, %v369_v59 }
 0x487   :  { %v608_v62 = vpop.f32.mrf.mxu1 }
 0x488   :  { %v443_v63 = vmax.f32 %v440_v61, 0.0 }
 0x48a   :  { %618 = vmatmul.mubr.msk.f32.vlgmr.msra.gmra.mxu0 %vm168_vm2, %v443_v63 }
 0x54a   :  { %v517_v2 = vpop.f32.mrf.mxu0 }
 0x54b   :  { %v518_v3 = vadd.f32 %v544_v1, %v517_v2 }
 0x54c   :  { %v619_v4 = vpop.f32.mrf.mxu0 }
 0x54d   :  { %632 = vtanh.f32 %v518_v3 }
 0x55a   :  { %v633_v0 = vpop.eup %632 }
 0x55b   :  { %522 = vst [vmem:[#allocation11] sm:$0xff] %v633_v0 }
 0x55c   :  { %745 = shalt.err (!%p742_p1)
}
 0x55d   :  { %532 = dma.vmem_to_hbm [thread:$0]  %s530_s4, 128, %s884_s5, [#allocation4]  }
 0x55e   :  { %760 = dma.done.wait [#allocation4], 128  }
 0x55f   :  { %761 = vsyncadd [#allocation4], 4294967168 }
 0x560   :  { %536 = vsyncpa [#allocation3], 1 }
 0x561   :  { %537 = vsyncpa [#allocation6], 1 }
 0x562   :  { %538 = vsyncpa [#allocation9], 1 }
 0x563   :  { %539 = vsyncpa [#allocation4], 1 }

</bundles_post_ra>
